<compile_context>
chip_gen: v6e
topology: v6e:2x2x1
jax: 0.10.0
libtpu: 0.0.40
codegen_flags: <defaults>
</compile_context>

<pallas_src>
import math

import jax
import jax.numpy as jnp
from jax.experimental import pallas as pl
from jax.experimental.pallas import tpu as pltpu


def _round_up(x, m):
    return ((x + m - 1) // m) * m


def _pick_tm(batch, tm_max):
    """Pick a sublane-aligned M tile that avoids gross padding waste.

    Prefer the largest candidate whose zero-row padding is <= 25% of the padded
    extent (keeps weight re-streaming low); otherwise minimize padded rows.
    """
    cands = [t for t in (512, 256, 128, 64, 32, 16) if t <= max(tm_max, 16)]
    for t in cands:  # descending
        m_pad = _round_up(batch, t)
        if 4 * (m_pad - batch) <= m_pad:
            return t
    return min(cands, key=lambda t: (_round_up(batch, t), -t))


def _split_tile(total, quantum):
    """Largest multiple of `quantum` <= total//2 that divides `total`, or None."""
    if total < 2 * quantum:
        return None
    start = (total // 2) // quantum * quantum
    for t in range(start, 0, -quantum):
        if total % t == 0:
            return t
    return None


def _is_v5e():
    try:
        kind = jax.devices()[0].device_kind.lower()
    except Exception:
        return False
    return ("v5 lite" in kind) or ("v5e" in kind) or ("v5litepod" in kind)


def linear_block_kernel(x_ref, w_ref, b_ref, o_ref, acc_ref):
    k = pl.program_id(2)

    # MXU matmul on bf16 operands, f32 accumulation. Compute once, then either
    # initialize the accumulator (k==0) or accumulate — no zero-fill pass.
    p = jnp.dot(x_ref[...], w_ref[...], preferred_element_type=jnp.float32)

    @pl.when(k == 0)
    def _init():
        acc_ref[...] = p

    @pl.when(k > 0)
    def _accum():
        acc_ref[...] += p

    @pl.when(k == pl.num_programs(2) - 1)
    def _finalize():
        # Epilogue (bias + ReLU + cast to final dtype) only on the last K step.
        y = acc_ref[...] + b_ref[...]            # (tm, tn) + (1, tn) broadcast
        o_ref[...] = jnp.maximum(y, 0.0).astype(o_ref.dtype)


def prepare_linear_block_params(weight_t, bias, *, tn=1024, tk=1024):
    """One-time weight/bias preparation (pad + bf16 cast), hoisted out of forward.

    weight_t: (K, N)  — transposed nn.Linear weight;  bias: (N,)
    Returns a dict consumed by linear_block_forward.
    """
    K, N = weight_t.shape
    tk_eff = min(tk, _round_up(K, 128))
    tn_eff = min(tn, _round_up(N, 128))
    K_pad = _round_up(K, tk_eff)
    N_pad = _round_up(N, tn_eff)

    if (K_pad, N_pad) == (K, N) and weight_t.dtype == jnp.bfloat16:
        w_p = weight_t                             # fast path: already aligned bf16
    else:
        w_p = (
            jnp.zeros((K_pad, N_pad), jnp.bfloat16)
            .at[:K, :N]
            .set(weight_t.astype(jnp.bfloat16))
        )
    b_p = jnp.zeros((1, N_pad), jnp.float32).at[0, :N].set(bias.astype(jnp.float32))
    return {"w": w_p, "b": b_p, "K": K, "N": N, "tk": tk_eff, "tn": tn_eff}


def linear_block_forward(x, params, *, tm=512):
    """x: (B, ...) -> flatten(1) -> (B, K); params from prepare_linear_block_params."""
    B = x.shape[0]
    x_flat = x.reshape(B, -1)
    K, N = params["K"], params["N"]
    w_p, b_p = params["w"], params["b"]
    tk_eff, tn_eff = params["tk"], params["tn"]
    K_pad, N_pad = w_p.shape
    assert x_flat.shape[1] == K, "flattened input features must equal in_channels"

    tm_eff = min(_pick_tm(B, tm), _round_up(B, 16))
    M_pad = _round_up(B, tm_eff)

    # v7x: a (1,1,k) grid leaves one TensorCore idle. If the parallel grid is a
    # single tile, split N (preferred) or M into >=2 aligned tiles.
    if (M_pad // tm_eff) * (N_pad // tn_eff) == 1:
        t = _split_tile(N_pad, 128)
        if t is not None:
            tn_eff = t
        else:
            t = _split_tile(M_pad, 16)
            if t is not None:
                tm_eff = t

    # Fast path: skip the activation pad/cast copy when already aligned bf16.
    if M_pad == B and K_pad == K and x_flat.dtype == jnp.bfloat16:
        x_p = x_flat
    else:
        x_p = (
            jnp.zeros((M_pad, K_pad), jnp.bfloat16)
            .at[:B, :K]
            .set(x_flat.astype(jnp.bfloat16))
        )

    out_dtype = x.dtype                      # emit final dtype directly from kernel
    out_bytes = jnp.dtype(out_dtype).itemsize

    grid = (M_pad // tm_eff, N_pad // tn_eff, K_pad // tk_eff)

    # v5e small-batch linears are weight-DMA-bound: deepen the W^T pipeline.
    small_batch = (M_pad // tm_eff) == 1
    deep_w = _is_v5e() and small_batch
    if deep_w:
        w_spec = pl.BlockSpec(
            (tk_eff, tn_eff), lambda i, j, k: (k, j), pipeline_mode=pl.Buffered(3)
        )
        w_bufs = 3
    else:
        w_spec = pl.BlockSpec((tk_eff, tn_eff), lambda i, j, k: (k, j))
        w_bufs = 2

    # Explicit VMEM budget: enough for the double-buffered tiles (with headroom),
    # capped well under v7x's 64 MiB physical VMEM.
    tile_bytes = (
        2 * tm_eff * tk_eff * 2          # x tile (bf16), double-buffered
        + w_bufs * tk_eff * tn_eff * 2   # W^T tile (bf16)
        + 2 * tn_eff * 4                 # bias tile (f32)
        + 2 * tm_eff * tn_eff * out_bytes  # output tile
        + tm_eff * tn_eff * 4            # f32 accumulator scratch
    )
    vmem_limit = int(min(max(2 * tile_bytes, 24 << 20), 48 << 20))

    cost = pl.CostEstimate(
        flops=2 * M_pad * K_pad * N_pad,
        transcendentals=0,
        bytes_accessed=(
            x_p.size * 2 + w_p.size * 2 + b_p.size * 4 + M_pad * N_pad * out_bytes
        ),
    )

    out_padded = pl.pallas_call(
        linear_block_kernel,
        out_shape=jax.ShapeDtypeStruct((M_pad, N_pad), out_dtype),
        grid_spec=pltpu.PrefetchScalarGridSpec(
            num_scalar_prefetch=0,
            grid=grid,
            in_specs=[
                pl.BlockSpec((tm_eff, tk_eff), lambda i, j, k: (i, k)),  # x tile
                w_spec,                                                  # W^T tile
                pl.BlockSpec((1, tn_eff), lambda i, j, k: (0, j)),       # bias tile
            ],
            out_specs=pl.BlockSpec((tm_eff, tn_eff), lambda i, j, k: (i, j)),
            scratch_shapes=[pltpu.VMEM((tm_eff, tn_eff), jnp.float32)],
        ),
        compiler_params=pltpu.CompilerParams(
            dimension_semantics=("parallel", "parallel", "arbitrary"),
            vmem_limit_bytes=vmem_limit,
        ),
        cost_estimate=cost,
    )(x_p, w_p, b_p)

    return out_padded[:B, :N]


def init_linear_params(key, in_features, out_features, dtype=jnp.float32):
    """Deterministic init matching nn.Linear default: U(-1/sqrt(K), 1/sqrt(K))."""
    k_w, k_b = jax.random.split(key)
    bound = 1.0 / math.sqrt(in_features)
    # PyTorch stores W as (out, in); we keep the transposed (in, out) layout.
    weight_t = jax.random.uniform(
        k_w, (in_features, out_features), dtype=dtype, minval=-bound, maxval=bound
    )
    bias = jax.random.uniform(
        k_b, (out_features,), dtype=dtype, minval=-bound, maxval=bound
    )
    return weight_t, bias


if __name__ == "__main__":
    key = jax.random.PRNGKey(0)
    k_x, k_p = jax.random.split(key)

    batch = 2
    in_channels = 32          # = 2 * 4 * 4 after flatten(1)
    out_channels = 32

    # 4-D input to exercise the flatten(1) path of LinearBlock.forward.
    x = jax.random.normal(k_x, (batch, 2, 4, 4), dtype=jnp.float32)
    weight_t, bias = init_linear_params(k_p, in_channels, out_channels)

    # One-time parameter preparation (pad + bf16 cast hoisted out of forward).
    params = prepare_linear_block_params(weight_t, bias)

    out = linear_block_forward(x, params)
    out = jax.block_until_ready(out)

    # Reference in plain JAX, matching the kernel's bf16 operand cast + f32 accum.
    x_flat = x.reshape(batch, -1)
    xr = x_flat.astype(jnp.bfloat16).astype(jnp.float32)
    wr = weight_t.astype(jnp.bfloat16).astype(jnp.float32)
    ref = jnp.maximum(xr @ wr + bias[None, :], 0.0).astype(x.dtype)

    assert out.shape == (batch, out_channels)
    assert out.dtype == x.dtype
    assert jnp.allclose(out.astype(jnp.float32), ref.astype(jnp.float32),
                        atol=1e-3, rtol=1e-3), "mismatch vs reference"

    print("KERNEL_OK")
</pallas_src>

<mosaic_0001>
module attributes {stable_mosaic.version = 11 : i64} {
  func.func @linear_block_kernel(%arg0: i32, %arg1: i32, %arg2: i32, %arg3: memref<16x128xbf16, #tpu.memory_space<vmem>>, %arg4: memref<128x128xbf16, #tpu.memory_space<vmem>>, %arg5: memref<1x128xf32, #tpu.memory_space<vmem>>, %arg6: memref<16x128xf32, #tpu.memory_space<vmem>>, %arg7: memref<16x128xf32, #tpu.memory_space<vmem>>) attributes {dimension_semantics = [#tpu.dimension_semantics<parallel>, #tpu.dimension_semantics<parallel>, #tpu.dimension_semantics<arbitrary>], iteration_bounds = array<i64: 1, 1, 1>, scalar_prefetch = 0 : i64, scratch_operands = 1 : i64, tpu.core_type = #tpu.core_type<tc>, window_params = [{transform_indices = @transform_0, window_bounds = array<i64: 16, 128>}, {transform_indices = @transform_1, window_bounds = array<i64: 128, 128>}, {transform_indices = @transform_2, window_bounds = array<i64: 1, 128>}, {transform_indices = @transform_3, window_bounds = array<i64: 16, 128>}]} {
    %c0 = arith.constant 0 : index
    %c0_0 = arith.constant 0 : index
    %0 = vector.load %arg3[%c0, %c0_0] : memref<16x128xbf16, #tpu.memory_space<vmem>>, vector<16x128xbf16>
    %c0_1 = arith.constant 0 : index
    %c0_2 = arith.constant 0 : index
    %1 = vector.load %arg4[%c0_1, %c0_2] : memref<128x128xbf16, #tpu.memory_space<vmem>>, vector<128x128xbf16>
    %cst = arith.constant dense<0.000000e+00> : vector<16x128xf32>
    %2 = tpu.matmul %0, %1, %cst {dimension_numbers = #tpu.dot_dimension_numbers<[1], [0], [0], [1], [0, 0, 1, 1], [], []>} : vector<16x128xbf16>, vector<128x128xbf16>, vector<16x128xf32> -> vector<16x128xf32>
    %c0_i32 = arith.constant 0 : i32
    %3 = arith.cmpi eq, %arg2, %c0_i32 : i32
    %4 = arith.extui %3 : i1 to i32
    %c0_i32_3 = arith.constant 0 : i32
    %5 = arith.cmpi ne, %4, %c0_i32_3 : i32
    scf.if %5 {
      %c0_8 = arith.constant 0 : index
      %c0_9 = arith.constant 0 : index
      %12 = vector.load %arg7[%c0_8, %c0_9] : memref<16x128xf32, #tpu.memory_space<vmem>>, vector<16x128xf32>
      tpu.vector_store %arg7[%c0_8, %c0_9], %2 {strides = array<i32>} : memref<16x128xf32, #tpu.memory_space<vmem>>, vector<16x128xf32>,
    } else {
    }
    %c0_i32_4 = arith.constant 0 : i32
    %6 = arith.cmpi sgt, %arg2, %c0_i32_4 : i32
    %7 = arith.extui %6 : i1 to i32
    %c0_i32_5 = arith.constant 0 : i32
    %8 = arith.cmpi ne, %7, %c0_i32_5 : i32
    scf.if %8 {
      %c0_8 = arith.constant 0 : index
      %c0_9 = arith.constant 0 : index
      %12 = vector.load %arg7[%c0_8, %c0_9] : memref<16x128xf32, #tpu.memory_space<vmem>>, vector<16x128xf32>
      %13 = arith.addf %12, %2 : vector<16x128xf32>
      %c0_10 = arith.constant 0 : index
      %c0_11 = arith.constant 0 : index
      %14 = vector.load %arg7[%c0_10, %c0_11] : memref<16x128xf32, #tpu.memory_space<vmem>>, vector<16x128xf32>
      tpu.vector_store %arg7[%c0_10, %c0_11], %13 {strides = array<i32>} : memref<16x128xf32, #tpu.memory_space<vmem>>, vector<16x128xf32>,
    } else {
    }
    %c0_i32_6 = arith.constant 0 : i32
    %9 = arith.cmpi eq, %arg2, %c0_i32_6 : i32
    %10 = arith.extui %9 : i1 to i32
    %c0_i32_7 = arith.constant 0 : i32
    %11 = arith.cmpi ne, %10, %c0_i32_7 : i32
    scf.if %11 {
      %c0_8 = arith.constant 0 : index
      %c0_9 = arith.constant 0 : index
      %12 = vector.load %arg7[%c0_8, %c0_9] : memref<16x128xf32, #tpu.memory_space<vmem>>, vector<16x128xf32>
      %c0_10 = arith.constant 0 : index
      %c0_11 = arith.constant 0 : index
      %13 = vector.load %arg5[%c0_10, %c0_11] : memref<1x128xf32, #tpu.memory_space<vmem>>, vector<1x128xf32>
      %14 = vector.broadcast %13 : vector<1x128xf32> to vector<16x128xf32>
      %15 = arith.addf %12, %14 : vector<16x128xf32>
      %cst_12 = arith.constant 0.000000e+00 : f32
      %16 = vector.broadcast %cst_12 : f32 to vector<16x128xf32>
      %17 = arith.maximumf %15, %16 : vector<16x128xf32>
      %c0_13 = arith.constant 0 : index
      %c0_14 = arith.constant 0 : index
      %18 = vector.load %arg6[%c0_13, %c0_14] : memref<16x128xf32, #tpu.memory_space<vmem>>, vector<16x128xf32>
      tpu.vector_store %arg6[%c0_13, %c0_14], %17 {strides = array<i32>} : memref<16x128xf32, #tpu.memory_space<vmem>>, vector<16x128xf32>,
    } else {
    }
    return
  }
  func.func @transform_0(%arg0: i32, %arg1: i32, %arg2: i32) -> (i32, i32) {
    %c0_i32 = arith.constant 0 : i32
    return %arg0, %arg2 : i32, i32
  }
  func.func @transform_1(%arg0: i32, %arg1: i32, %arg2: i32) -> (i32, i32) {
    %c0_i32 = arith.constant 0 : i32
    return %arg2, %arg1 : i32, i32
  }
  func.func @transform_2(%arg0: i32, %arg1: i32, %arg2: i32) -> (i32, i32) {
    %c0_i32 = arith.constant 0 : i32
    %c0_i32_0 = arith.constant 0 : i32
    return %c0_i32, %arg1 : i32, i32
  }
  func.func @transform_3(%arg0: i32, %arg1: i32, %arg2: i32) -> (i32, i32) {
    %c0_i32 = arith.constant 0 : i32
    return %arg0, %arg1 : i32, i32
  }
}

</mosaic_0001>

<bundles_post_ra>
// kernel: tpu_custom_call.1
= control target key start
LH: loop header
LB: loop body
LE: loop exit
PB: predicated region body
PF: predicated region fallthrough
CT: control target
= control target key end

     0   :  { %8 = vsyncpa [#allocation4], 0  ;;  %s373_s0 = inlined_call_operand.hbm [shape: bf16[16,128], index: 0, kind: input, shape index: {}]   ;;  %s374_s1 = inlined_call_operand.hbm [shape: bf16[128,128], index: 1, kind: input, shape index: {}]   ;;  %s375_s2 = inlined_call_operand.vmem [shape: f32[1,128], index: 2, kind: input, shape index: {}]   ;;  %s376_s3 = inlined_call_operand.hbm [shape: f32[16,128], index: 3, kind: output, shape index: {}]  }
   0x1   :  { %9 = vsyncpa [#allocation7], 0 }
   0x2   :  { %10 = vsyncpa [#allocation5], 0  ;;  %s332_s12 = smov [#allocation3]  }
   0x3   :  { %s16_s13 = sshll.u32 %s332_s12, 4  ;;  %s17_s13 = int_to_ptr.vmem [resolvable:$true] %s16_s13 }
   0x4   :  { %s274_s14 = scalar_lea.vmem %s17_s13, 128  ;;  %p279_p1 = scmp.lt.s32.totalorder %s17_s13, %s17_s13 }
   0x5   :  { %p275_p0 = scmp.ne.s32.totalorder %s17_s13, %s274_s14  ;;  %p280_p2 = scmp.lt.s32.totalorder %s274_s14, %s274_s14 }
   0x7   :  { %p281_p3 = por %p280_p2, %p279_p1 }
   0x9   :  { %p282_p4 = pnand %p281_p3, %p275_p0 }
   0xb   :  { %285 = shalt.err (!%p282_p4)
}
   0xc   :  { %s333_s15 = smov 64   ;;  %s334_s16 = smov 4  }
   0xd   :  { %22 = dma.hbm_to_vmem [thread:$0]  %s373_s0, 128, %s17_s13, [#allocation4], %s333_s15, %s333_s15, %s334_s16  }
   0xe   :  { %s335_s19 = smov [#allocation6]  }
   0xf   :  { %s28_s20 = sshll.u32 %s335_s19, 4  ;;  %s29_s20 = int_to_ptr.vmem [resolvable:$true] %s28_s20 }
  0x10   :  { %s294_s21 = scalar_lea.vmem %s29_s20, 1024  ;;  %p299_p6 = scmp.lt.s32.totalorder %s29_s20, %s29_s20 }
  0x11   :  { %p295_p5 = scmp.ne.s32.totalorder %s29_s20, %s294_s21  ;;  %p300_p7 = scmp.lt.s32.totalorder %s294_s21, %s294_s21 }
  0x13   :  { %p301_p8 = por %p300_p7, %p299_p6 }
  0x15   :  { %p302_p9 = pnand %p301_p8, %p295_p5 }
  0x17   :  { %305 = shalt.err (!%p302_p9)
}
  0x18   :  { %34 = dma.hbm_to_vmem [thread:$0]  %s374_s1, 1024, %s29_s20, [#allocation7], %s333_s15, %s333_s15, %s334_s16  }
  0x19   :  { %326 = dma.done.wait [#allocation4], 128  }
  0x1a   :  { %327 = vsyncadd [#allocation4], 4294967168 }
  0x1b   :  { %328 = dma.done.wait [#allocation7], 1024  }
  0x1c   :  { %329 = vsyncadd [#allocation7], 4294966272  ;;  %v336_v0 = vmov 0.0   ;;  %vm337_vm0 = vmmov 0   ;;  %v257_v1 = vld [vmem:[#allocation6 + $0x38] sm:$0xff]   ;;  %v258_v2 = vld [vmem:[#allocation6 + $0x30] sm:$0xff]  }
  0x1d   :  { %228 = vmatprep.subr.bf16.mxu0 %v336_v0  ;;  %244 = vmatprep.mubr.msk.bf16.mxu0 %vm337_vm0, %v336_v0  ;;  %v259_v3 = vld [vmem:[#allocation6 + $0x28] sm:$0xff]   ;;  %v260_v4 = vld [vmem:[#allocation6 + $0x20] sm:$0xff]   ;;  %v261_v5 = vld [vmem:[#allocation6 + $0x18] sm:$0xff]   ;;  %s338_s24 = smov [#allocation8]  }
  0x1e   :  { %229 = vmatpush3.bf16.msra.mxu0 %v257_v1  ;;  %v262_v6 = vld [vmem:[#allocation6 + $0x10] sm:$0xff]   ;;  %v263_v7 = vld [vmem:[#allocation6 + $0x8] sm:$0xff]   ;;  %v264_v8 = vld [vmem:[#allocation6] sm:$0xff]   ;;  %s196_s25 = sshll.u32 %s338_s24, 4  ;;  %s197_s25 = int_to_ptr.vmem [resolvable:$true] %s196_s25 }
  0x1f   :  { %230 = vmatprep.subr.bf16.mxu0 %v336_v0  ;;  %v265_v9 = vld [vmem:[#allocation3] sm:$0xff]   ;;  %s306_s26 = scalar_lea.vmem %s197_s25, 256  ;;  %p311_p11 = scmp.lt.s32.totalorder %s197_s25, %s197_s25 }
  0x20   :  { %v218_v10 = vld [vmem:[%s375_s2] ss:$0 sm:$0xff]  ;;  %p307_p10 = scmp.ne.s32.totalorder %s197_s25, %s306_s26  ;;  %p312_p12 = scmp.lt.s32.totalorder %s306_s26, %s306_s26 }
  0x22   :  { %231 = vmatpush3.bf16.msra.mxu0 %v258_v2  ;;  %p313_p13 = por %p312_p12, %p311_p11 }
  0x23   :  { %232 = vmatprep.subr.bf16.mxu0 %v336_v0 }
  0x24   :  { %p314_p0 = pnand %p313_p13, %p307_p10 }
  0x26   :  { %233 = vmatpush3.bf16.msra.mxu0 %v259_v3 }
  0x27   :  { %234 = vmatprep.subr.bf16.mxu0 %v336_v0 }
  0x2a   :  { %235 = vmatpush3.bf16.msra.mxu0 %v260_v4 }
  0x2b   :  { %236 = vmatprep.subr.bf16.mxu0 %v336_v0 }
  0x2e   :  { %237 = vmatpush3.bf16.msra.mxu0 %v261_v5 }
  0x2f   :  { %238 = vmatprep.subr.bf16.mxu0 %v336_v0 }
  0x32   :  { %239 = vmatpush3.bf16.msra.mxu0 %v262_v6 }
  0x33   :  { %240 = vmatprep.subr.bf16.mxu0 %v336_v0 }
  0x36   :  { %241 = vmatpush3.bf16.msra.mxu0 %v263_v7 }
  0x37   :  { %242 = vmatprep.subr.bf16.mxu0 %v336_v0 }
  0x3a   :  { %243 = vmatpush3.bf16.msra.mxu0 %v264_v8 }
  0x3d   :  { %245 = vmatmul.mubr.bf16.vlgmr.msra.gmra.mxu0 %v265_v9 }
  0xfd   :  { %v150_v11 = vpop.f32.mrf.mxu0 }
  0xfe   :  { %v185_v12 = vadd.f32 %v218_v10, %v150_v11 }
  0xff   :  { %v246_v13 = vpop.f32.mrf.mxu0 }
 0x100   :  { %v187_v14 = vmax.f32 %v185_v12, 0.0 }
 0x101   :  { %v153_v15 = vpop.f32.mrf.mxu0 }
 0x102   :  { %189 = vst [vmem:[#allocation8] sm:$0xff] %v187_v14  ;;  %v186_v16 = vadd.f32 %v218_v10, %v153_v15 }
 0x103   :  { %v247_v17 = vpop.f32.mrf.mxu0 }
 0x104   :  { %v188_v18 = vmax.f32 %v186_v16, 0.0 }
 0x106   :  { %190 = vst [vmem:[#allocation8 + $0x8] sm:$0xff] %v188_v18 }
 0x107   :  { %317 = shalt.err (!%p314_p0)
}
 0x108   :  { %s339_s2 = smov 128   ;;  %s340_s27 = smov 8  }
 0x109   :  { %202 = dma.vmem_to_hbm [thread:$0]  %s197_s25, 256, %s376_s3, [#allocation5], %s339_s2, %s339_s2, %s340_s27  }
 0x10a   :  { %330 = dma.done.wait [#allocation5], 256  }
 0x10b   :  { %331 = vsyncadd [#allocation5], 4294967040 }
 0x10c   :  { %206 = vsyncpa [#allocation4], 1 }
 0x10d   :  { %207 = vsyncpa [#allocation7], 1 }
 0x10e   :  { %208 = vsyncpa [#allocation5], 1 }

</bundles_post_ra>
